<compile_context>
chip_gen: v7x
topology: tpu7x:2x2x1
jax: 0.10.0
libtpu: 0.0.40
codegen_flags: <defaults>
</compile_context>

<pallas_src>
import functools

import numpy as np
import jax
import jax.numpy as jnp
from jax.experimental import pallas as pl
from jax.experimental.pallas import tpu as pltpu

BN_EPS = 1e-5


def _round_up(x, m):
    return ((x + m - 1) // m) * m


# ------------------------------------------------------------------ kernels --

def _proj_kernel(x_ref, w_ref, bias_ref, o_ref):
    """1x1 conv as (Co,Ci)@(Ci,Ts) bf16 matmul (f32 acc) + folded BN bias + ReLU.

    x_ref: (1, Ci, Ts) f32   w_ref: (Co, Ci) bf16 (BN scale pre-folded)
    bias_ref: (Co, 1) f32    o_ref: (1, Co, Ts)
    Lane dim = spatial tile Ts (lane-dense output).
    """
    y = jnp.dot(w_ref[...], x_ref[0].astype(jnp.bfloat16),
                preferred_element_type=jnp.float32)
    y = y + bias_ref[...]
    o_ref[0] = jnp.maximum(y, 0.0).astype(o_ref.dtype)


def _upsample_kernel(uy_ref, uxT_ref, x_ref, o_ref):
    """Separable depthwise bilinear ConvTranspose2d: out = Uy @ X @ Ux^T per plane.

    uy_ref: (Ho, H) bf16   uxT_ref: (W, Wo) bf16   x_ref: (1, Cb, H, W) f32
    o_ref: (1, Cb, Ho, Wo)
    Both passes are single batched MXU calls over the channel block (bf16 operands,
    f32 accumulation) -- no per-plane Python loop, no reshapes/transposes.
    """
    cb = x_ref.shape[1]
    xb = x_ref[0].astype(jnp.bfloat16)                                   # (Cb,H,W)
    uxTb = jnp.broadcast_to(uxT_ref[...], (cb,) + uxT_ref.shape)          # (Cb,W,Wo)
    uyb = jnp.broadcast_to(uy_ref[...], (cb,) + uy_ref.shape)             # (Cb,Ho,H)
    t = jnp.einsum('chw,cwx->chx', xb, uxTb,
                   preferred_element_type=jnp.float32)                    # (Cb,H,Wo)
    out = jnp.einsum('coh,chx->cox', uyb, t.astype(jnp.bfloat16),
                     preferred_element_type=jnp.float32)                  # (Cb,Ho,Wo)
    o_ref[0] = out.astype(o_ref.dtype)


def _node_kernel(x1_ref, x2_ref, w_ref, bias_ref, mask_ref, o_ref, xpad_ref,
                 *, h, wd, k, d, off0):
    """k x k conv over the (virtual) concat of two inputs + folded BN + ReLU.

    x1_ref/x2_ref: (1, D, S) f32 with S = H*W flattened (lane dim)
    w_ref        : (k*k, Co, 2D) bf16 -- per-tap (Co,2D) weight, BN scale pre-folded
    mask_ref     : (k, S) f32 column masks zeroing the x-wraparound of flat shifts
    o_ref        : (1, Co, S)
    xpad_ref     : VMEM scratch (2D, Spad) bf16  zero-padded flat image, interior
                   starts at the 128-aligned offset off0

    Each of the k*k taps is a contiguous lane-offset slice of the padded buffer
    (dy handled by the flat zero padding) contracted with its (Co,2D) weight on the
    MXU and accumulated in f32 registers -- no materialized im2col.  The x-wrap mask
    is constant along the contracted dim, so it is applied once per kx to the (Co,S)
    partial sum (after the matmul, on the smaller Co rows).
    """
    p = k // 2
    s = h * wd
    hp = p * wd + p

    # Zero only the pad columns the taps actually read; the interior is fully
    # overwritten below (scratch persists across grid steps, so this stays cheap
    # and is correct regardless of how grid steps are assigned to cores).
    zpad = jnp.zeros((2 * d, hp), dtype=xpad_ref.dtype)
    xpad_ref[:, off0 - hp:off0] = zpad
    xpad_ref[:, off0 + s:off0 + s + hp] = zpad

    # Interior writes: (virtual) channel concat of the two inputs, cast to bf16
    # once.  off0 and s keep the big stores lane-aligned / lane-dense.
    xpad_ref[0:d, off0:off0 + s] = x1_ref[0].astype(jnp.bfloat16)
    xpad_ref[d:2 * d, off0:off0 + s] = x2_ref[0].astype(jnp.bfloat16)

    acc = None
    for kx in range(k):                      # static unroll, k is small (e.g. 3)
        part = None
        for ky in range(k):
            shift = (ky - p) * wd + (kx - p)
            sl = xpad_ref[:, off0 + shift:off0 + shift + s]         # (2D, S) bf16
            y = jnp.dot(w_ref[ky * k + kx], sl,
                        preferred_element_type=jnp.float32)         # (Co, S) f32
            part = y if part is None else part + y
        if kx != p:                          # center column never wraps
            part = part * mask_ref[kx:kx + 1, :]
        acc = part if acc is None else acc + part

    acc = acc + bias_ref[...]
    o_ref[0] = jnp.maximum(acc, 0.0).astype(o_ref.dtype)


# ----------------------------------------------------------------- wrappers --

def proj_conv_bn_relu(x, w, scale, bias):
    """x: (N,Ci,H,W), w: (Co,Ci), scale/bias: (Co,1) -> (N,Co,H,W)."""
    n, ci, h, wd = x.shape
    co = w.shape[0]
    s = h * wd
    ts = s if s <= 2048 else 2048            # spatial tile (multiple of 128 when tiling)
    wf = (w * scale).astype(jnp.bfloat16)    # fold BN scale into the weight, bf16 MXU
    grid = (n, pl.cdiv(s, ts))
    need = 2 * (4 * ci * ts + 2 * ci * co + 4 * co * ts + 4 * co)
    vlim = int(min(max(need + (8 << 20), 16 << 20), 64 << 20))
    out = pl.pallas_call(
        _proj_kernel,
        out_shape=jax.ShapeDtypeStruct((n, co, s), x.dtype),
        grid=grid,
        in_specs=[
            pl.BlockSpec((1, ci, ts), lambda b, j: (b, 0, j)),
            pl.BlockSpec((co, ci), lambda b, j: (0, 0)),
            pl.BlockSpec((co, 1), lambda b, j: (0, 0)),
        ],
        out_specs=pl.BlockSpec((1, co, ts), lambda b, j: (b, 0, j)),
        compiler_params=pltpu.CompilerParams(
            dimension_semantics=("parallel", "parallel"),
            vmem_limit_bytes=vlim),
        cost_estimate=pl.CostEstimate(
            flops=2 * n * s * ci * co,
            transcendentals=0,
            bytes_accessed=4 * (n * ci * s + n * co * s) + 2 * ci * co + 4 * co),
    )(x.reshape(n, ci, s), wf, bias)
    return out.reshape(n, co, h, wd)


def _channel_block(c, h, w, ho, wo, budget=4 << 20):
    """Largest divisor of c whose per-block VMEM footprint fits the budget."""
    per = 4 * (h * w + ho * wo) + 4 * (h * wo) + 2 * (ho * h + w * wo)
    cb = max(1, min(c, budget // max(per, 1)))
    while c % cb:
        cb -= 1
    return cb


def bilinear_upsample(x, uy, uxT):
    """x: (N,C,H,W), uy: (Ho,H), uxT: (W,Wo) -> (N,C,Ho,Wo)."""
    n, c, h, wd = x.shape
    ho, wo = uy.shape[0], uxT.shape[1]
    uy_b = uy.astype(jnp.bfloat16)           # bilinear taps are exact in bf16
    uxT_b = uxT.astype(jnp.bfloat16)
    cb = _channel_block(c, h, wd, ho, wo)
    grid = (n, c // cb)
    return pl.pallas_call(
        _upsample_kernel,
        out_shape=jax.ShapeDtypeStruct((n, c, ho, wo), x.dtype),
        grid=grid,
        in_specs=[
            pl.BlockSpec((ho, h), lambda b, j: (0, 0)),
            pl.BlockSpec((wd, wo), lambda b, j: (0, 0)),
            pl.BlockSpec((1, cb, h, wd), lambda b, j: (b, j, 0, 0)),
        ],
        out_specs=pl.BlockSpec((1, cb, ho, wo), lambda b, j: (b, j, 0, 0)),
        compiler_params=pltpu.CompilerParams(
            dimension_semantics=("parallel", "parallel")),
        cost_estimate=pl.CostEstimate(
            flops=2 * n * c * (h * wd * wo + ho * h * wo),
            transcendentals=0,
            bytes_accessed=4 * (n * c * h * wd + n * c * ho * wo)
            + 2 * (ho * h + wd * wo)),
    )(uy_b, uxT_b, x)


def node_conv_bn_relu(x1, x2, w, scale, bias):
    """kxk conv (stride 1, pad k//2) of concat([x1,x2], axis=1) + BN + ReLU.

    x1, x2: (N,D,H,W), w: (k,k,2D,Co) (HWIO over the concat channels) -> (N,Co,H,W).
    """
    n, d, h, wd = x1.shape
    k = w.shape[0]
    co = w.shape[3]
    p = k // 2
    s = h * wd
    hp = p * wd + p
    off0 = _round_up(hp, 128)                # lane-aligned interior offset
    spad = _round_up(off0 + s + hp, 128)

    # Fold BN scale into the conv weight, regroup per tap: (k*k, Co, 2D) bf16.
    wtaps = jnp.transpose(w, (0, 1, 3, 2)) * scale.reshape(1, 1, co, 1)
    wtaps = wtaps.reshape(k * k, co, 2 * d).astype(jnp.bfloat16)

    # Column masks for the flat-shift taps (zero the x-direction wraparound).
    col = jnp.arange(s, dtype=jnp.int32) % wd
    masks = jnp.stack(
        [((col + (kx - p) >= 0) & (col + (kx - p) < wd)).astype(jnp.float32)
         for kx in range(k)], axis=0)                          # (k, S)

    need = (2 * 4 * (2 * d * s + co * s)     # double-buffered f32 I/O blocks
            + 2 * (2 * d) * spad             # bf16 padded scratch
            + 4 * (k * s + co) + 2 * k * k * co * 2 * d)
    vlim = int(min(max(need + (8 << 20), 16 << 20), 64 << 20))

    kern = functools.partial(_node_kernel, h=h, wd=wd, k=k, d=d, off0=off0)
    out = pl.pallas_call(
        kern,
        out_shape=jax.ShapeDtypeStruct((n, co, s), x1.dtype),
        grid=(n,),
        in_specs=[
            pl.BlockSpec((1, d, s), lambda b: (b, 0, 0)),
            pl.BlockSpec((1, d, s), lambda b: (b, 0, 0)),
            pl.BlockSpec((k * k, co, 2 * d), lambda b: (0, 0, 0)),
            pl.BlockSpec((co, 1), lambda b: (0, 0)),
            pl.BlockSpec((k, s), lambda b: (0, 0)),
        ],
        out_specs=pl.BlockSpec((1, co, s), lambda b: (b, 0, 0)),
        scratch_shapes=[
            pltpu.VMEM((2 * d, spad), jnp.bfloat16),           # padded flat image
        ],
        compiler_params=pltpu.CompilerParams(
            dimension_semantics=("parallel",),
            vmem_limit_bytes=vlim),
        cost_estimate=pl.CostEstimate(
            flops=2 * n * co * (k * k * 2 * d) * s,
            transcendentals=0,
            bytes_accessed=4 * (2 * n * d * s + n * co * s)
            + 2 * k * k * co * 2 * d + 4 * (k * s + co)),
    )(x1.reshape(n, d, s), x2.reshape(n, d, s), wtaps, bias, masks)
    return out.reshape(n, co, h, wd)


# ------------------------------------------------------- parameter plumbing --

def _bilinear_1d_matrix(size_in, f):
    """Dense 1-D operator equivalent to ConvTranspose1d(k=2f, stride=f, pad=f//2)
    with the bilinear weights produced by fill_up_weights()."""
    k = 2 * f
    pad = f // 2
    size_out = (size_in - 1) * f - 2 * pad + k
    c = (2 * f - 1 - f % 2) / (2.0 * f)
    w1d = np.array([1.0 - abs(i / f - c) for i in range(k)], dtype=np.float64)
    u = np.zeros((size_out, size_in), dtype=np.float64)
    for o in range(size_out):
        for i in range(size_in):
            ki = o - i * f + pad
            if 0 <= ki < k:
                u[o, i] = w1d[ki]
    return u


def make_upsample_operators(h_in, w_in, f):
    """Separable 1-D operators: out = Uy @ X @ Ux^T per channel plane.

    Exact for the depthwise transposed conv since fill_up_weights gives every
    channel the same separable bilinear kernel (kron(Uy,Ux) == Uy (.) Ux^T)."""
    uy = _bilinear_1d_matrix(h_in, f).astype(np.float32)      # (Ho, H)
    uxT = _bilinear_1d_matrix(w_in, f).astype(np.float32).T   # (W, Wo)
    return jnp.asarray(uy), jnp.asarray(uxT)


def init_ida_up_params(key, node_kernel, out_dim, channels, up_factors):
    """Deterministic synthetic init: conv weights ~ 0.05*N(0,1); BatchNorm at
    PyTorch init (gamma=1, beta=0, mean=0, var=1), folded to scale/bias."""
    del up_factors  # upsample weights come from fill_up_weights (deterministic)
    params = {}
    bn_scale = jnp.full((out_dim, 1), 1.0 / np.sqrt(1.0 + BN_EPS), jnp.float32)
    bn_bias = jnp.zeros((out_dim, 1), jnp.float32)
    for i, c in enumerate(channels):
        if c != out_dim:
            key, sub = jax.random.split(key)
            params[f"proj_{i}"] = {
                "w": 0.05 * jax.random.normal(sub, (out_dim, c), jnp.float32),
                "scale": bn_scale,
                "bias": bn_bias,
            }
    for i in range(1, len(channels)):
        key, sub = jax.random.split(key)
        params[f"node_{i}"] = {
            # HWIO weight over the concat channels [x, ups[i]]
            "w": 0.05 * jax.random.normal(
                sub, (node_kernel, node_kernel, 2 * out_dim, out_dim), jnp.float32),
            "scale": bn_scale,
            "bias": bn_bias,
        }
    return params


# ------------------------------------------------------------------ forward --

def ida_up_forward(params, layers_nchw, channels, out_dim, up_factors):
    assert len(channels) == len(layers_nchw)
    ups = []
    for i, l in enumerate(layers_nchw):                # stays NCHW end-to-end
        if channels[i] != out_dim:                     # proj_i (else Identity)
            p = params[f"proj_{i}"]
            l = proj_conv_bn_relu(l, p["w"], p["scale"], p["bias"])
        f = int(up_factors[i])
        if f != 1:                                     # up_i (else Identity)
            _, _, h, w = l.shape
            uy, uxT = make_upsample_operators(h, w, f)
            l = bilinear_upsample(l, uy, uxT)
        ups.append(l)

    x = ups[0]
    ys = []
    for i in range(1, len(ups)):                       # node_i on (virtual) concat
        p = params[f"node_{i}"]
        x = node_conv_bn_relu(x, ups[i], p["w"], p["scale"], p["bias"])
        ys.append(x)
    return x, ys


# --------------------------------------------------------------------- main --

if __name__ == "__main__":
    node_kernel = 3
    out_dim = 4
    channels = [4, 8, 16]
    up_factors = np.array([1, 2, 4], dtype=np.int64)
    batch, base = 2, 16

    key = jax.random.PRNGKey(0)
    k_params, *k_layers = jax.random.split(key, 1 + len(channels))
    layers = [
        jax.random.normal(
            k_layers[i],
            (batch, channels[i],
             base // int(up_factors[i]), base // int(up_factors[i])),
            jnp.float32)
        for i in range(len(channels))
    ]

    params = init_ida_up_params(k_params, node_kernel, out_dim, channels,
                                up_factors)
    x, ys = ida_up_forward(params, layers, channels, out_dim, up_factors)

    jax.block_until_ready(x)
    for y in ys:
        jax.block_until_ready(y)

    assert x.shape == (batch, out_dim, base, base), x.shape
    assert len(ys) == len(channels) - 1
    assert all(y.shape == (batch, out_dim, base, base) for y in ys)
    assert bool(jnp.all(jnp.isfinite(x)))
    print("KERNEL_OK")
</pallas_src>

<mosaic_0001>
module attributes {stable_mosaic.version = 11 : i64} {
  func.func @_proj_kernel(%arg0: i32, %arg1: i32, %arg2: memref<1x8x64xf32, #tpu.memory_space<vmem>>, %arg3: memref<4x8xbf16, #tpu.memory_space<vmem>>, %arg4: memref<4x1xf32, #tpu.memory_space<vmem>>, %arg5: memref<1x4x64xf32, #tpu.memory_space<vmem>>) attributes {dimension_semantics = [#tpu.dimension_semantics<parallel>, #tpu.dimension_semantics<parallel>], iteration_bounds = array<i64: 2, 1>, scalar_prefetch = 0 : i64, scratch_operands = 0 : i64, tpu.core_type = #tpu.core_type<tc>, window_params = [{transform_indices = @transform_0, window_bounds = array<i64: 1, 8, 64>}, {pipeline_mode = #tpu.pipeline_mode<synchronous>, transform_indices = @transform_1, window_bounds = array<i64: 4, 8>}, {pipeline_mode = #tpu.pipeline_mode<synchronous>, transform_indices = @transform_2, window_bounds = array<i64: 4, 1>}, {transform_indices = @transform_3, window_bounds = array<i64: 1, 4, 64>}]} {
    %c0 = arith.constant 0 : index
    %c0_0 = arith.constant 0 : index
    %0 = vector.load %arg3[%c0, %c0_0] : memref<4x8xbf16, #tpu.memory_space<vmem>>, vector<4x8xbf16>
    %c0_1 = arith.constant 0 : index
    %c0_2 = arith.constant 0 : index
    %c0_3 = arith.constant 0 : index
    %1 = vector.load %arg2[%c0_1, %c0_2, %c0_3] : memref<1x8x64xf32, #tpu.memory_space<vmem>>, vector<1x8x64xf32>
    %2 = vector.shape_cast %1 : vector<1x8x64xf32> to vector<8x64xf32>
    %3 = arith.truncf %2 : vector<8x64xf32> to vector<8x64xbf16>
    %cst = arith.constant dense<0.000000e+00> : vector<4x64xf32>
    %4 = tpu.matmul %0, %3, %cst {dimension_numbers = #tpu.dot_dimension_numbers<[1], [0], [0], [1], [0, 0, 1, 1], [], []>} : vector<4x8xbf16>, vector<8x64xbf16>, vector<4x64xf32> -> vector<4x64xf32>
    %c0_4 = arith.constant 0 : index
    %c0_5 = arith.constant 0 : index
    %5 = vector.load %arg4[%c0_4, %c0_5] : memref<4x1xf32, #tpu.memory_space<vmem>>, vector<4x1xf32>
    %6 = vector.broadcast %5 : vector<4x1xf32> to vector<4x64xf32>
    %7 = arith.addf %4, %6 : vector<4x64xf32>
    %cst_6 = arith.constant 0.000000e+00 : f32
    %8 = vector.broadcast %cst_6 : f32 to vector<4x64xf32>
    %9 = arith.maximumf %7, %8 : vector<4x64xf32>
    %c0_7 = arith.constant 0 : index
    %c0_8 = arith.constant 0 : index
    %c0_9 = arith.constant 0 : index
    %10 = vector.load %arg5[%c0_7, %c0_8, %c0_9] : memref<1x4x64xf32, #tpu.memory_space<vmem>>, vector<1x4x64xf32>
    %11 = vector.shape_cast %10 : vector<1x4x64xf32> to vector<4x64xf32>
    %12 = vector.shape_cast %9 : vector<4x64xf32> to vector<1x4x64xf32>
    tpu.vector_store %arg5[%c0_7, %c0_8, %c0_9], %12 {strides = array<i32>} : memref<1x4x64xf32, #tpu.memory_space<vmem>>, vector<1x4x64xf32>,
    return
  }
  func.func @transform_0(%arg0: i32, %arg1: i32) -> (i32, i32, i32) {
    %c0_i32 = arith.constant 0 : i32
    %c0_i32_0 = arith.constant 0 : i32
    return %arg0, %c0_i32, %arg1 : i32, i32, i32
  }
  func.func @transform_1(%arg0: i32, %arg1: i32) -> (i32, i32) {
    %c0_i32 = arith.constant 0 : i32
    %c0_i32_0 = arith.constant 0 : i32
    %c0_i32_1 = arith.constant 0 : i32
    return %c0_i32, %c0_i32_0 : i32, i32
  }
  func.func @transform_2(%arg0: i32, %arg1: i32) -> (i32, i32) {
    %c0_i32 = arith.constant 0 : i32
    %c0_i32_0 = arith.constant 0 : i32
    %c0_i32_1 = arith.constant 0 : i32
    return %c0_i32, %c0_i32_0 : i32, i32
  }
  func.func @transform_3(%arg0: i32, %arg1: i32) -> (i32, i32, i32) {
    %c0_i32 = arith.constant 0 : i32
    %c0_i32_0 = arith.constant 0 : i32
    return %arg0, %c0_i32, %arg1 : i32, i32, i32
  }
}

</mosaic_0001>

<bundles_post_ra>
// kernel: tpu_custom_call.1
= control target key start
LH: loop header
LB: loop body
LE: loop exit
PB: predicated region body
PF: predicated region fallthrough
CT: control target
= control target key end

     0   :  { %8 = vsyncpa [#allocation3], 0  ;;  %s765_s0 = inlined_call_operand.hbm [shape: f32[2,8,64], index: 0, kind: input, shape index: {}]   ;;  %s766_s1 = inlined_call_operand.vmem [shape: bf16[4,8], index: 1, kind: input, shape index: {}]   ;;  %s767_s2 = inlined_call_operand.vmem [shape: f32[4,1], index: 2, kind: input, shape index: {}]   ;;  %s768_s3 = inlined_call_operand.hbm [shape: f32[2,4,64], index: 3, kind: output, shape index: {}]  }
   0x1   :  { %10 = vsyncpa [#allocation3 + $0x1], 0 }
   0x2   :  { %11 = vsyncpa [#allocation4], 0 }
   0x3   :  { %13 = vsyncpa [#allocation4 + $0x1], 0  ;;  %s586_s12 = smov 0   ;;  %s588_s13 = smov 0  }
   0x4   :  { %s590_s14 = smov 0   ;;  %s592_s15 = smov 0  }
   0x5   :  { %s594_s16 = smov 0   ;;  %s596_s17 = smov 0  }
   0x6 LB: > { %s359_s18 = sadd.s32 4294967295, %s559_s17   ;;  %s360_s19 = sadd.s32 4294967294, %s559_s17   ;;  %s559_s17 = sphi %s596_s17, %s19_s17   ;;  %s555_s16 = sphi %s594_s16, %s784_s16   ;;  %s551_s15 = sphi %s592_s15, %s783_s15   ;;  %s547_s14 = sphi %s590_s14, %s782_s14   ;;  %s543_s13 = sphi %s588_s13, %s781_s13   ;;  %s539_s12 = sphi %s586_s12, %s780_s12  }
   0x7   : > { %s31_s20 = sadd.s32 1, %s555_s16  ;;  %s40_s21 = sadd.s32 1, %s547_s14 }
   0x8   : > { %p33_p0 = scmp.ge.s32.totalorder %s31_s20, 2  ;;  %p47_p1 = scmp.ne.s32.totalorder %s547_s14, %s543_s13 }
   0x9   : > { %p48_p2 = scmp.eq.s32.totalorder %s559_s17, 0  ;;  %p53_p3 = scmp.ne.s32.totalorder %s543_s13, %s539_s12 }
   0xa   : > { %s786_s20 = smov (%p33_p0, %s31_s20), 0  ;;  %p54_p5 = scmp.eq.s32.totalorder %s359_s18, 0 }
   0xb   : > { %p627_p4 = por %p48_p2, %p47_p1  ;;  %s35_s23 = ssub.s32 %s555_s16, %s786_s20 }
   0xc   : > { %p121_p6 = scmp.eq.s32.totalorder %s359_s18, 1  ;;  %p38_p7 = scmp.eq.s32.totalorder %s35_s23, 0 }
   0xd   : > { %p633_p8 = por %p54_p5, %p53_p3  ;;  %p127_p10 = scmp.eq.s32.totalorder %s360_s19, 1 }
   0xe   : > { %p637_p9 = por %p121_p6, %p47_p1  ;;  %p393_p13 = scmp.lt.s32.totalorder %s559_s17, 2 }
   0xf   : > { %s642_s26 = scalar_select %p38_p7, %s547_s14, %s40_s21  }
  0x10   : > { %s772_s25 = scalar_select %p637_p9, 1, 0 }
  0x11   : > { %p644_p11 = por %p127_p10, %p53_p3  ;;  %s153_s28 = sand.u32 1, %s547_s14  }
  0x12   : > { %s363_s29 = sshll.u32 %s153_s28, 3  ;;  %s364_s30 = sshll.u32 %s555_s16, 7 }
  0x13   : > { %s773_s27 = scalar_select %p644_p11, 1, 0 }
  0x14   : > { %s655_s6 = scalar_lea.hbm %s765_s0, %s364_s30  ;;  %s157_s7 = scalar_lea.vmem [#allocation2], %s363_s29 }
  0x15   : > { %s165_s8 = sshll.u32 %s157_s7, 4  ;;  %p661_p0 = pnand %p393_p13, %p627_p4  ;;  %s657_s8 = int_to_ptr.vmem [resolvable:$true] %s165_s8 }
  0x16   : > { %s154_s10 = scalar_lea.sflag [#allocation3], %s153_s28  ;;  %s447_s11 = scalar_lea.hbm %s655_s6, 128 }
  0x17   : > { %p448_p3 = scmp.ne.s32.totalorder %s655_s6, %s447_s11  ;;  %p449_p5 = pneg %p661_p0 }
  0x18   : > { %s452_s21 = scalar_lea.hbm %s765_s0, 256  ;;  %p453_p4 = scmp.lt.u32.totalorder %s655_s6, %s765_s0 }
  0x19   : > { %p450_p6 = pnand %p449_p5, %p448_p3  ;;  %p454_p10 = scmp.lt.u32.totalorder %s452_s21, %s447_s11 }
  0x1a   : > { %p456_p12 = scmp.lt.u32.totalorder %s447_s11, %s655_s6 }
  0x1b   : > { %p451_p7 = pneg %p450_p6  ;;  %p455_p13 = por %p454_p10, %p453_p4 }
  0x1d   : > { %p457_p1 = por %p456_p12, %p455_p13 }
  0x1f   : > { %p458_p2 = pnand %p457_p1, %p451_p7 }
  0x21   : > { %461 = shalt.err (!%p458_p2)
}
  0x22   : > { %s462_s28 = scalar_lea.vmem %s657_s8, 128  ;;  %s561_s29 = smov [#allocation2]  }
  0x23   : > { %p463_p3 = scmp.ne.s32.totalorder %s657_s8, %s462_s28  ;;  %s467_s30 = sshll.u32 %s561_s29, 4  ;;  %s468_s30 = int_to_ptr.vmem [resolvable:$false] %s467_s30 }
  0x24   : > { %s469_s4 = scalar_lea.vmem %s468_s30, 256  ;;  %p470_p9 = scmp.lt.s32.totalorder %s657_s8, %s468_s30 }
  0x25   : > { %p465_p6 = pnand %p463_p3, %p449_p5  ;;  %p471_p4 = scmp.lt.s32.totalorder %s469_s4, %s462_s28 }
  0x27   : > { %p466_p11 = pneg %p465_p6  ;;  %p472_p10 = por %p471_p4, %p470_p9 }
  0x29   : > { %p473_p12 = pnand %p472_p10, %p466_p11 }
  0x2b   : > { %476 = shalt.err (!%p473_p12)
}
  0x2c   : > { %388 = dma.hbm_to_vmem [thread:$0]  (!%p661_p0), %s655_s6, 128, %s657_s8, %s154_s10  }
  0x2d   : > { %p775_p1 = scmp.lt.s32.totalorder %s559_s17, 3  ;;  %p776_p2 = scmp.ge.s32.totalorder %s559_s17, 1 }
  0x2f   : > { %p171_p5 = pnand %p776_p2, %p775_p1 }
  0x30   : > { %s697_s5 = sand.u32 (!%p171_p5), 1, %s543_s13  }
  0x31   : > { %174 = sbr.rel (%p171_p5) target bundleno = 294 (0x126), region = 32  ;;  %s366_s7 = sshll.u32 (!%p171_p5), %s697_s5, 3 }
  0x32   : > { %s177_s11 = scalar_lea.sflag (!%p171_p5), [#allocation3], %s697_s5  ;;  %s180_s18 = scalar_lea.vmem (!%p171_p5), [#allocation2], %s366_s7 }
  0x38   : > { %530 = dma.done.wait (%p633_p8), %s177_s11, 128  }
  0x39   : > { %532 = vsyncadd (%p633_p8), %s177_s11, 4294967168  ;;  %v562_v0 = vmov 0.0   ;;  %vm563_vm0 = vmmov 0   ;;  %v564_v1 = vmov 0   ;;  %v205_v2 = vld [vmem:[%s180_s18] sm:$0xff]  ;;  %vm217_vm1 = vcmask 1043456  }
  0x3a   : > { %375 = vmatprep.subr.bf16.mxu0 %v562_v0  ;;  %377 = vmatprep.mubr.msk.bf16.mxu0 %vm563_vm0, %v562_v0  ;;  %v207_v3 = vld [vmem:[%s767_s2] sm:$0xf]  ;;  %v206_v4 = vpack.c.bf16 %v205_v2, %v205_v2  ;;  %vm213_vm2 = vcmask 64512   ;;  %s367_s10 = sshll.u32 %s697_s5, 2  ;;  %s370_s19 = sshll.u32 %s551_s15, 6  ;;  %vm262_vm3 = vcmask 519168  }
  0x3b   : > { %446 = vset.pattern.permute.xlu0 %v564_v1  ;;  %v204_v6 = vld [vmem:[%s766_s1] sm:$0x3]  ;;  %s202_s21 = scalar_lea.vmem [#allocation5], %s367_s10  ;;  %s716_s29 = scalar_lea.hbm %s768_s3, %s370_s19 }
  0x3c   : > { %210 = vperm.xlu0 %446, %v207_v3   ;;  %v219_v5 = vsel %vm217_vm1, %v206_v4, 0  ;;  %s279_s22 = sshll.u32 %s202_s21, 4  ;;  %s265_s15 = scalar_lea.sflag [#allocation4], %s697_s5  ;;  %s718_s22 = int_to_ptr.vmem [resolvable:$true] %s279_s22 }
  0x3d   : > { %376 = vmatpush3.bf16.msra.mxu0 %v219_v5  ;;  %s477_s30 = scalar_lea.vmem %s718_s22, 64  ;;  %p777_p9 = scmp.ne.s32.totalorder %s772_s25, 0 }
  0x3e   : > { %p478_p8 = scmp.ne.s32.totalorder %s718_s22, %s477_s30  ;;  %s565_s4 = smov [#allocation5]  }
  0x3f   : > { %s481_s7 = sshll.u32 %s565_s4, 4  ;;  %s482_s7 = int_to_ptr.vmem [resolvable:$false] %s481_s7 }
  0x40   : > { %378 = vmatmul.mubr.msk.bf16.vlgmr.msra.gmra.mrb[0].mxu0 %vm213_vm2, %v204_v6  ;;  %p479_p11 = pnand %p478_p8, %p777_p9  ;;  %s483_s11 = scalar_lea.vmem %s482_s7, 128 }
  0x41   : > { %p484_p7 = scmp.lt.s32.totalorder %s718_s22, %s482_s7  ;;  %p485_p13 = scmp.lt.s32.totalorder %s483_s11, %s477_s30 }
  0x42   : > { %p480_p0 = pneg %p479_p11 }
  0x43   : > { %p486_p3 = por %p485_p13, %p484_p7 }
  0x45   : > { %p487_p6 = pnand %p486_p3, %p480_p0 }
  0xbb   : > { %v211_v7 = vpop.permute.xlu0 %210 }
 0x113   : > { %v255_v8 = vpop.f32.mrb[0].mxu0 }
 0x114   : > { %v256_v9 = vadd.f32 %v255_v8, %v211_v7  ;;  %v379_v10 = vpop.f32.mrb[1].mxu0 }
 0x115   : > { %v258_v11 = vpop.f32.mrb[2].mxu0 }
 0x116   : > { %v261_v12 = vmax.f32 %v256_v9, 0.0  ;;  %v380_v13 = vpop.f32.mrb[3].mxu0 }
 0x118   : > { %263 = vst.msk [vmem:[%s202_s21] sm:$0xf] %vm262_vm3, %v261_v12 }
 0x119   : > { %490 = shalt.err (!%p487_p6)
}
 0x11a   : > { %s491_s5 = scalar_lea.hbm %s716_s29, 64  ;;  %s495_s8 = scalar_lea.hbm %s768_s3, 128 }
 0x11b   : > { %p492_p4 = scmp.ne.s32.totalorder %s716_s29, %s491_s5  ;;  %p496_p1 = scmp.lt.u32.totalorder %s716_s29, %s768_s3 }
 0x11c   : > { %p497_p2 = scmp.lt.u32.totalorder %s495_s8, %s491_s5  ;;  %p499_p8 = scmp.lt.u32.totalorder %s491_s5, %s716_s29 }
 0x11d   : > { %p493_p10 = pnand %p492_p4, %p777_p9 }
 0x11e   : > { %p498_p5 = por %p497_p2, %p496_p1 }
 0x11f   : > { %p494_p12 = pneg %p493_p10 }
 0x120   : > { %p500_p11 = por %p499_p8, %p498_p5 }
 0x122   : > { %p501_p0 = pnand %p500_p11, %p494_p12 }
 0x124   : > { %504 = shalt.err (!%p501_p0)
}
 0x125   : > { %383 = dma.vmem_to_hbm [thread:$0]  (%p777_p9), %s718_s22, 64, %s716_s29, %s265_s15  }
 0x126 PF: > { %s291_s10 = sand.u32 1, %s539_s12   ;;  %p778_p7 = scmp.ne.s32.totalorder %s773_s27, 0 }
 0x127   : > { %p779_p13 = scmp.ge.s32.totalorder %s559_s17, 2  ;;  %s292_s19 = scalar_lea.sflag [#allocation4], %s291_s10 }
 0x129   : > { %p390_p3 = pnand %p779_p13, %p778_p7 }
 0x12b   : > { %534 = dma.done.wait (!%p390_p3), %s292_s19, 64  }
 0x12c   : > { %536 = vsyncadd (!%p390_p3), %s292_s19, 4294967232  ;;  %s19_s17 = sadd.s32 1, %s559_s17   ;;  %s780_s12 = smov %s543_s13 }
 0x12d   : > { %p16_p6 = scmp.ge.s32.totalorder %s19_s17, 4   ;;  %s781_s13 = smov %s547_s14 }
 0x12e   : > { %s782_s14 = smov %s642_s26  ;;  %s783_s15 = smov %s555_s16 }
 0x12f   : > { %s784_s16 = smov %s786_s20  ;;  %18 = sbr.rel (!%p16_p6) target bundleno = 6 (0x6), region = 77 }
 0x136   :  { %297 = vsyncpa [#allocation3], 1 }
 0x137   :  { %299 = vsyncpa [#allocation3 + $0x1], 1 }
 0x138   :  { %300 = vsyncpa [#allocation4], 1 }
 0x139   :  { %302 = vsyncpa [#allocation4 + $0x1], 1 }

</bundles_post_ra>
